<compile_context>
chip_gen: v7x
topology: tpu7x:2x2x1
jax: 0.10.0
libtpu: 0.0.40
codegen_flags: <defaults>
</compile_context>

<pallas_src>
import functools

import jax
import jax.numpy as jnp
from jax import lax
from jax.experimental import pallas as pl
from jax.experimental.pallas import tpu as pltpu


def _round_up(x, m):
    return ((x + m - 1) // m) * m


def _conv_tap_kernel(w_ref, b_ref, x_ref, o_ref, *, kh_count, kw_count, img_w, hw_out):
    """Valid conv as a sum of KH*KW shifted (CO,CIN)x(CIN,HW) matmuls.

    w_ref: (T, CO_PAD, CIN)     one (CO_PAD, CIN) weight slice per spatial tap
    b_ref: (CO_PAD, 1)          bias (zero padded to 8 rows)
    x_ref: (nb, CIN, HW_IN)     nb images, spatial flattened on the lane axis;
                                lane-padded so every tap window stays in bounds
    o_ref: (nb, CO_PAD, HW_OUT) per-image output, lane-dense (128-multiple)
    """
    nb = o_ref.shape[0]
    w = w_ref[...]                                         # (T, CO_PAD, CIN)
    acc = jnp.zeros(o_ref.shape, jnp.float32)
    for t in range(kh_count * kw_count):
        kh, kw = divmod(t, kw_count)
        shift = kh * img_w + kw                            # static lane offset of this tap
        xt = x_ref[:, :, shift:shift + hw_out]             # (nb, CIN, HW_OUT) static slice
        wt = jnp.broadcast_to(w[t][None], (nb,) + w.shape[1:])   # (nb, CO_PAD, CIN)
        # Batched so the dot_general output is (n, c, m) directly — no in-kernel
        # transpose / relayout of the accumulator.
        acc = acc + jnp.einsum("nck,nkm->ncm", wt, xt,
                               preferred_element_type=jnp.float32)
    o_ref[...] = (acc + b_ref[...][None]).astype(o_ref.dtype)


@jax.jit
def conv2d_pallas(x_nchw, weight_oihw, bias):
    """Equivalent of Demo.forward(x): Conv2d(3 -> 6, k=3, stride=1, padding=0)."""
    N, Cin, H, W = x_nchw.shape
    Cout, _, KH, KW = weight_oihw.shape
    OH, OW = H - KH + 1, W - KW + 1
    T = KH * KW
    CO_PAD = 8                                   # full sublane group -> unmasked stores
    HW = H * W
    max_shift = (KH - 1) * W + (KW - 1)          # largest in-kernel tap offset
    HW_OUT = _round_up(HW, 128)                  # lane-dense output width
    HW_IN = _round_up(HW + max_shift, 128)       # input width: every tap slice in bounds

    # Only wrapper copy of x: a free reshape + one small lane pad (no transpose,
    # no 9x im2col materialization).
    x = x_nchw.astype(jnp.float32).reshape(N, Cin, HW)
    x = jnp.pad(x, ((0, 0), (0, 0), (0, HW_IN - HW)))

    # Weight taps: (Cout, Cin, KH, KW) -> (KH*KW, CO_PAD, Cin), t = kh*KW + kw.
    w_taps = jnp.transpose(weight_oihw.astype(jnp.float32), (2, 3, 0, 1)).reshape(T, Cout, Cin)
    w_taps = jnp.pad(w_taps, ((0, 0), (0, CO_PAD - Cout), (0, 0)))
    b2d = jnp.pad(bias.astype(jnp.float32).reshape(Cout, 1), ((0, CO_PAD - Cout), (0, 0)))

    # Batch tile: enough lanes of work per grid step to amortize the ~0.35us
    # per-step cost, capped by an explicit VMEM budget (Pallas double-buffers
    # the x and out blocks; keep 2*nb*bytes_per_image well under v5e's 16 MiB
    # default scoped VMEM and v7x's 64 MiB physical VMEM).  Single grid step
    # for tiny inputs; >=2 "parallel" steps (pipelined, v7x dual-TC) when N grows.
    target_lanes = 4096
    bytes_per_image = (Cin * HW_IN + CO_PAD * HW_OUT) * 4
    vmem_budget = 6 * 1024 * 1024
    nb = max(1, min(N,
                    max(1, target_lanes // HW_OUT),
                    max(1, vmem_budget // (2 * bytes_per_image))))
    while N % nb:                                # keep the grid exact (no ragged edge)
        nb -= 1
    grid = (N // nb,)

    kernel = functools.partial(_conv_tap_kernel,
                               kh_count=KH, kw_count=KW, img_w=W, hw_out=HW_OUT)

    out = pl.pallas_call(
        kernel,
        out_shape=jax.ShapeDtypeStruct((N, CO_PAD, HW_OUT), jnp.float32),
        grid=grid,
        in_specs=[
            pl.BlockSpec((T, CO_PAD, Cin), lambda i: (0, 0, 0)),   # weight taps: resident
            pl.BlockSpec((CO_PAD, 1), lambda i: (0, 0)),           # bias: resident
            pl.BlockSpec((nb, Cin, HW_IN), lambda i: (i, 0, 0)),   # batch block of images
        ],
        out_specs=pl.BlockSpec((nb, CO_PAD, HW_OUT), lambda i: (i, 0, 0)),
        compiler_params=pltpu.CompilerParams(
            dimension_semantics=("parallel",)),
    )(w_taps, b2d, x)

    # Crop channels (6 of 8) and the valid spatial window; reshapes straight to
    # NCHW — no output transpose.
    out = out[:, :Cout, :HW].reshape(N, Cout, H, W)[:, :, :OH, :OW]
    return out


if __name__ == "__main__":
    key = jax.random.PRNGKey(0)
    kx, k_w, k_b = jax.random.split(key, 3)

    # Small shapes consistent with Conv2d(3 -> 6, k=3): batch=2, C=3, H=W=16.
    N, Cin, H, W = 2, 3, 16, 16
    Cout, KH, KW = 6, 3, 3

    x = jax.random.normal(kx, (N, Cin, H, W), dtype=jnp.float32)
    fan_in = Cin * KH * KW
    bound = 1.0 / (fan_in ** 0.5)
    weight = jax.random.uniform(k_w, (Cout, Cin, KH, KW), jnp.float32, -bound, bound)
    bias = jax.random.uniform(k_b, (Cout,), jnp.float32, -bound, bound)

    out = jax.block_until_ready(conv2d_pallas(x, weight, bias))

    # Reference check against XLA's conv.
    ref = lax.conv_general_dilated(
        x, weight, window_strides=(1, 1), padding="VALID",
        dimension_numbers=("NCHW", "OIHW", "NCHW"),
    ) + bias[None, :, None, None]

    assert out.shape == (N, Cout, H - KH + 1, W - KW + 1)
    assert jnp.allclose(out, ref, atol=1e-4, rtol=1e-4), "mismatch vs reference conv"

    print("KERNEL_OK")
</pallas_src>

<mosaic_0001>
module attributes {stable_mosaic.version = 11 : i64} {
  func.func @_conv_tap_kernel(%arg0: i32, %arg1: memref<9x8x3xf32, #tpu.memory_space<vmem>>, %arg2: memref<8x1xf32, #tpu.memory_space<vmem>>, %arg3: memref<2x3x384xf32, #tpu.memory_space<vmem>>, %arg4: memref<2x8x256xf32, #tpu.memory_space<vmem>>) attributes {dimension_semantics = [#tpu.dimension_semantics<parallel>], iteration_bounds = array<i64: 1>, scalar_prefetch = 0 : i64, scratch_operands = 0 : i64, tpu.core_type = #tpu.core_type<tc>, window_params = [{pipeline_mode = #tpu.pipeline_mode<synchronous>, transform_indices = @transform_0, window_bounds = array<i64: 9, 8, 3>}, {pipeline_mode = #tpu.pipeline_mode<synchronous>, transform_indices = @transform_1, window_bounds = array<i64: 8, 1>}, {transform_indices = @transform_2, window_bounds = array<i64: 2, 3, 384>}, {transform_indices = @transform_3, window_bounds = array<i64: 2, 8, 256>}]} {
    %c0 = arith.constant 0 : index
    %c0_0 = arith.constant 0 : index
    %c0_1 = arith.constant 0 : index
    %0 = vector.load %arg1[%c0, %c0_0, %c0_1] : memref<9x8x3xf32, #tpu.memory_space<vmem>>, vector<9x8x3xf32>
    %cst = arith.constant 0.000000e+00 : f32
    %1 = vector.broadcast %cst : f32 to vector<2x8x256xf32>
    %c0_2 = arith.constant 0 : index
    %c0_3 = arith.constant 0 : index
    %c0_4 = arith.constant 0 : index
    %2 = vector.load %arg3[%c0_2, %c0_3, %c0_4] : memref<2x3x384xf32, #tpu.memory_space<vmem>>, vector<2x3x256xf32>
    %3 = vector.extract_strided_slice %0 {offsets = [0, 0, 0], sizes = [1, 8, 3], strides = [1, 1, 1]} : vector<9x8x3xf32> to vector<1x8x3xf32>
    %4 = vector.shape_cast %3 : vector<1x8x3xf32> to vector<8x3xf32>
    %5 = vector.shape_cast %4 : vector<8x3xf32> to vector<1x8x3xf32>
    %6 = vector.shape_cast %5 : vector<1x8x3xf32> to vector<1x8x3xf32>
    %7 = vector.broadcast %6 : vector<1x8x3xf32> to vector<2x8x3xf32>
    "tpu.trace_start"() <{level = 10 : i32, message = "nck,nkm->ncm"}> : () -> ()
    %cst_5 = arith.constant dense<0.000000e+00> : vector<2x8x256xf32>
    %8 = tpu.matmul %7, %2, %cst_5 {dimension_numbers = #tpu.dot_dimension_numbers<[2], [1], [1], [2], [0, 0, 0, 1, 1, 2], [0], [0]>} : vector<2x8x3xf32>, vector<2x3x256xf32>, vector<2x8x256xf32> -> vector<2x8x256xf32>
    "tpu.trace_stop"() : () -> ()
    %9 = arith.addf %1, %8 : vector<2x8x256xf32>
    %c0_6 = arith.constant 0 : index
    %c0_7 = arith.constant 0 : index
    %c1 = arith.constant 1 : index
    %10 = vector.load %arg3[%c0_6, %c0_7, %c1] : memref<2x3x384xf32, #tpu.memory_space<vmem>>, vector<2x3x256xf32>
    %11 = vector.extract_strided_slice %0 {offsets = [1, 0, 0], sizes = [1, 8, 3], strides = [1, 1, 1]} : vector<9x8x3xf32> to vector<1x8x3xf32>
    %12 = vector.shape_cast %11 : vector<1x8x3xf32> to vector<8x3xf32>
    %13 = vector.shape_cast %12 : vector<8x3xf32> to vector<1x8x3xf32>
    %14 = vector.shape_cast %13 : vector<1x8x3xf32> to vector<1x8x3xf32>
    %15 = vector.broadcast %14 : vector<1x8x3xf32> to vector<2x8x3xf32>
    "tpu.trace_start"() <{level = 10 : i32, message = "nck,nkm->ncm"}> : () -> ()
    %cst_8 = arith.constant dense<0.000000e+00> : vector<2x8x256xf32>
    %16 = tpu.matmul %15, %10, %cst_8 {dimension_numbers = #tpu.dot_dimension_numbers<[2], [1], [1], [2], [0, 0, 0, 1, 1, 2], [0], [0]>} : vector<2x8x3xf32>, vector<2x3x256xf32>, vector<2x8x256xf32> -> vector<2x8x256xf32>
    "tpu.trace_stop"() : () -> ()
    %17 = arith.addf %9, %16 : vector<2x8x256xf32>
    %c0_9 = arith.constant 0 : index
    %c0_10 = arith.constant 0 : index
    %c2 = arith.constant 2 : index
    %18 = vector.load %arg3[%c0_9, %c0_10, %c2] : memref<2x3x384xf32, #tpu.memory_space<vmem>>, vector<2x3x256xf32>
    %19 = vector.extract_strided_slice %0 {offsets = [2, 0, 0], sizes = [1, 8, 3], strides = [1, 1, 1]} : vector<9x8x3xf32> to vector<1x8x3xf32>
    %20 = vector.shape_cast %19 : vector<1x8x3xf32> to vector<8x3xf32>
    %21 = vector.shape_cast %20 : vector<8x3xf32> to vector<1x8x3xf32>
    %22 = vector.shape_cast %21 : vector<1x8x3xf32> to vector<1x8x3xf32>
    %23 = vector.broadcast %22 : vector<1x8x3xf32> to vector<2x8x3xf32>
    "tpu.trace_start"() <{level = 10 : i32, message = "nck,nkm->ncm"}> : () -> ()
    %cst_11 = arith.constant dense<0.000000e+00> : vector<2x8x256xf32>
    %24 = tpu.matmul %23, %18, %cst_11 {dimension_numbers = #tpu.dot_dimension_numbers<[2], [1], [1], [2], [0, 0, 0, 1, 1, 2], [0], [0]>} : vector<2x8x3xf32>, vector<2x3x256xf32>, vector<2x8x256xf32> -> vector<2x8x256xf32>
    "tpu.trace_stop"() : () -> ()
    %25 = arith.addf %17, %24 : vector<2x8x256xf32>
    %c0_12 = arith.constant 0 : index
    %c0_13 = arith.constant 0 : index
    %c16 = arith.constant 16 : index
    %26 = vector.load %arg3[%c0_12, %c0_13, %c16] : memref<2x3x384xf32, #tpu.memory_space<vmem>>, vector<2x3x256xf32>
    %27 = vector.extract_strided_slice %0 {offsets = [3, 0, 0], sizes = [1, 8, 3], strides = [1, 1, 1]} : vector<9x8x3xf32> to vector<1x8x3xf32>
    %28 = vector.shape_cast %27 : vector<1x8x3xf32> to vector<8x3xf32>
    %29 = vector.shape_cast %28 : vector<8x3xf32> to vector<1x8x3xf32>
    %30 = vector.shape_cast %29 : vector<1x8x3xf32> to vector<1x8x3xf32>
    %31 = vector.broadcast %30 : vector<1x8x3xf32> to vector<2x8x3xf32>
    "tpu.trace_start"() <{level = 10 : i32, message = "nck,nkm->ncm"}> : () -> ()
    %cst_14 = arith.constant dense<0.000000e+00> : vector<2x8x256xf32>
    %32 = tpu.matmul %31, %26, %cst_14 {dimension_numbers = #tpu.dot_dimension_numbers<[2], [1], [1], [2], [0, 0, 0, 1, 1, 2], [0], [0]>} : vector<2x8x3xf32>, vector<2x3x256xf32>, vector<2x8x256xf32> -> vector<2x8x256xf32>
    "tpu.trace_stop"() : () -> ()
    %33 = arith.addf %25, %32 : vector<2x8x256xf32>
    %c0_15 = arith.constant 0 : index
    %c0_16 = arith.constant 0 : index
    %c17 = arith.constant 17 : index
    %34 = vector.load %arg3[%c0_15, %c0_16, %c17] : memref<2x3x384xf32, #tpu.memory_space<vmem>>, vector<2x3x256xf32>
    %35 = vector.extract_strided_slice %0 {offsets = [4, 0, 0], sizes = [1, 8, 3], strides = [1, 1, 1]} : vector<9x8x3xf32> to vector<1x8x3xf32>
    %36 = vector.shape_cast %35 : vector<1x8x3xf32> to vector<8x3xf32>
    %37 = vector.shape_cast %36 : vector<8x3xf32> to vector<1x8x3xf32>
    %38 = vector.shape_cast %37 : vector<1x8x3xf32> to vector<1x8x3xf32>
    %39 = vector.broadcast %38 : vector<1x8x3xf32> to vector<2x8x3xf32>
    "tpu.trace_start"() <{level = 10 : i32, message = "nck,nkm->ncm"}> : () -> ()
    %cst_17 = arith.constant dense<0.000000e+00> : vector<2x8x256xf32>
    %40 = tpu.matmul %39, %34, %cst_17 {dimension_numbers = #tpu.dot_dimension_numbers<[2], [1], [1], [2], [0, 0, 0, 1, 1, 2], [0], [0]>} : vector<2x8x3xf32>, vector<2x3x256xf32>, vector<2x8x256xf32> -> vector<2x8x256xf32>
    "tpu.trace_stop"() : () -> ()
    %41 = arith.addf %33, %40 : vector<2x8x256xf32>
    %c0_18 = arith.constant 0 : index
    %c0_19 = arith.constant 0 : index
    %c18 = arith.constant 18 : index
    %42 = vector.load %arg3[%c0_18, %c0_19, %c18] : memref<2x3x384xf32, #tpu.memory_space<vmem>>, vector<2x3x256xf32>
    %43 = vector.extract_strided_slice %0 {offsets = [5, 0, 0], sizes = [1, 8, 3], strides = [1, 1, 1]} : vector<9x8x3xf32> to vector<1x8x3xf32>
    %44 = vector.shape_cast %43 : vector<1x8x3xf32> to vector<8x3xf32>
    %45 = vector.shape_cast %44 : vector<8x3xf32> to vector<1x8x3xf32>
    %46 = vector.shape_cast %45 : vector<1x8x3xf32> to vector<1x8x3xf32>
    %47 = vector.broadcast %46 : vector<1x8x3xf32> to vector<2x8x3xf32>
    "tpu.trace_start"() <{level = 10 : i32, message = "nck,nkm->ncm"}> : () -> ()
    %cst_20 = arith.constant dense<0.000000e+00> : vector<2x8x256xf32>
    %48 = tpu.matmul %47, %42, %cst_20 {dimension_numbers = #tpu.dot_dimension_numbers<[2], [1], [1], [2], [0, 0, 0, 1, 1, 2], [0], [0]>} : vector<2x8x3xf32>, vector<2x3x256xf32>, vector<2x8x256xf32> -> vector<2x8x256xf32>
    "tpu.trace_stop"() : () -> ()
    %49 = arith.addf %41, %48 : vector<2x8x256xf32>
    %c0_21 = arith.constant 0 : index
    %c0_22 = arith.constant 0 : index
    %c32 = arith.constant 32 : index
    %50 = vector.load %arg3[%c0_21, %c0_22, %c32] : memref<2x3x384xf32, #tpu.memory_space<vmem>>, vector<2x3x256xf32>
    %51 = vector.extract_strided_slice %0 {offsets = [6, 0, 0], sizes = [1, 8, 3], strides = [1, 1, 1]} : vector<9x8x3xf32> to vector<1x8x3xf32>
    %52 = vector.shape_cast %51 : vector<1x8x3xf32> to vector<8x3xf32>
    %53 = vector.shape_cast %52 : vector<8x3xf32> to vector<1x8x3xf32>
    %54 = vector.shape_cast %53 : vector<1x8x3xf32> to vector<1x8x3xf32>
    %55 = vector.broadcast %54 : vector<1x8x3xf32> to vector<2x8x3xf32>
    "tpu.trace_start"() <{level = 10 : i32, message = "nck,nkm->ncm"}> : () -> ()
    %cst_23 = arith.constant dense<0.000000e+00> : vector<2x8x256xf32>
    %56 = tpu.matmul %55, %50, %cst_23 {dimension_numbers = #tpu.dot_dimension_numbers<[2], [1], [1], [2], [0, 0, 0, 1, 1, 2], [0], [0]>} : vector<2x8x3xf32>, vector<2x3x256xf32>, vector<2x8x256xf32> -> vector<2x8x256xf32>
    "tpu.trace_stop"() : () -> ()
    %57 = arith.addf %49, %56 : vector<2x8x256xf32>
    %c0_24 = arith.constant 0 : index
    %c0_25 = arith.constant 0 : index
    %c33 = arith.constant 33 : index
    %58 = vector.load %arg3[%c0_24, %c0_25, %c33] : memref<2x3x384xf32, #tpu.memory_space<vmem>>, vector<2x3x256xf32>
    %59 = vector.extract_strided_slice %0 {offsets = [7, 0, 0], sizes = [1, 8, 3], strides = [1, 1, 1]} : vector<9x8x3xf32> to vector<1x8x3xf32>
    %60 = vector.shape_cast %59 : vector<1x8x3xf32> to vector<8x3xf32>
    %61 = vector.shape_cast %60 : vector<8x3xf32> to vector<1x8x3xf32>
    %62 = vector.shape_cast %61 : vector<1x8x3xf32> to vector<1x8x3xf32>
    %63 = vector.broadcast %62 : vector<1x8x3xf32> to vector<2x8x3xf32>
    "tpu.trace_start"() <{level = 10 : i32, message = "nck,nkm->ncm"}> : () -> ()
    %cst_26 = arith.constant dense<0.000000e+00> : vector<2x8x256xf32>
    %64 = tpu.matmul %63, %58, %cst_26 {dimension_numbers = #tpu.dot_dimension_numbers<[2], [1], [1], [2], [0, 0, 0, 1, 1, 2], [0], [0]>} : vector<2x8x3xf32>, vector<2x3x256xf32>, vector<2x8x256xf32> -> vector<2x8x256xf32>
    "tpu.trace_stop"() : () -> ()
    %65 = arith.addf %57, %64 : vector<2x8x256xf32>
    %c0_27 = arith.constant 0 : index
    %c0_28 = arith.constant 0 : index
    %c34 = arith.constant 34 : index
    %66 = vector.load %arg3[%c0_27, %c0_28, %c34] : memref<2x3x384xf32, #tpu.memory_space<vmem>>, vector<2x3x256xf32>
    %67 = vector.extract_strided_slice %0 {offsets = [8, 0, 0], sizes = [1, 8, 3], strides = [1, 1, 1]} : vector<9x8x3xf32> to vector<1x8x3xf32>
    %68 = vector.shape_cast %67 : vector<1x8x3xf32> to vector<8x3xf32>
    %69 = vector.shape_cast %68 : vector<8x3xf32> to vector<1x8x3xf32>
    %70 = vector.shape_cast %69 : vector<1x8x3xf32> to vector<1x8x3xf32>
    %71 = vector.broadcast %70 : vector<1x8x3xf32> to vector<2x8x3xf32>
    "tpu.trace_start"() <{level = 10 : i32, message = "nck,nkm->ncm"}> : () -> ()
    %cst_29 = arith.constant dense<0.000000e+00> : vector<2x8x256xf32>
    %72 = tpu.matmul %71, %66, %cst_29 {dimension_numbers = #tpu.dot_dimension_numbers<[2], [1], [1], [2], [0, 0, 0, 1, 1, 2], [0], [0]>} : vector<2x8x3xf32>, vector<2x3x256xf32>, vector<2x8x256xf32> -> vector<2x8x256xf32>
    "tpu.trace_stop"() : () -> ()
    %73 = arith.addf %65, %72 : vector<2x8x256xf32>
    %c0_30 = arith.constant 0 : index
    %c0_31 = arith.constant 0 : index
    %74 = vector.load %arg2[%c0_30, %c0_31] : memref<8x1xf32, #tpu.memory_space<vmem>>, vector<8x1xf32>
    %75 = vector.shape_cast %74 : vector<8x1xf32> to vector<1x8x1xf32>
    %76 = vector.broadcast %75 : vector<1x8x1xf32> to vector<2x8x256xf32>
    %77 = arith.addf %73, %76 : vector<2x8x256xf32>
    %c0_32 = arith.constant 0 : index
    %c0_33 = arith.constant 0 : index
    %c0_34 = arith.constant 0 : index
    %78 = vector.load %arg4[%c0_32, %c0_33, %c0_34] : memref<2x8x256xf32, #tpu.memory_space<vmem>>, vector<2x8x256xf32>
    tpu.vector_store %arg4[%c0_32, %c0_33, %c0_34], %77 {strides = array<i32>} : memref<2x8x256xf32, #tpu.memory_space<vmem>>, vector<2x8x256xf32>,
    return
  }
  func.func @transform_0(%arg0: i32) -> (i32, i32, i32) {
    %c0_i32 = arith.constant 0 : i32
    %c0_i32_0 = arith.constant 0 : i32
    %c0_i32_1 = arith.constant 0 : i32
    %c0_i32_2 = arith.constant 0 : i32
    return %c0_i32, %c0_i32_0, %c0_i32_1 : i32, i32, i32
  }
  func.func @transform_1(%arg0: i32) -> (i32, i32) {
    %c0_i32 = arith.constant 0 : i32
    %c0_i32_0 = arith.constant 0 : i32
    %c0_i32_1 = arith.constant 0 : i32
    return %c0_i32, %c0_i32_0 : i32, i32
  }
  func.func @transform_2(%arg0: i32) -> (i32, i32, i32) {
    %c0_i32 = arith.constant 0 : i32
    %c0_i32_0 = arith.constant 0 : i32
    %c0_i32_1 = arith.constant 0 : i32
    return %arg0, %c0_i32, %c0_i32_0 : i32, i32, i32
  }
  func.func @transform_3(%arg0: i32) -> (i32, i32, i32) {
    %c0_i32 = arith.constant 0 : i32
    %c0_i32_0 = arith.constant 0 : i32
    %c0_i32_1 = arith.constant 0 : i32
    return %arg0, %c0_i32, %c0_i32_0 : i32, i32, i32
  }
}

</mosaic_0001>

<bundles_post_ra>
// kernel: conv2d_pallas.1
= control target key start
LH: loop header
LB: loop body
LE: loop exit
PB: predicated region body
PF: predicated region fallthrough
CT: control target
= control target key end

     0   :  { %v1785_v3 = vmov 0.0   ;;  %s1786_s18 = smov 127   ;;  %s1787_s27 = smov 126   ;;  %v1793_v47 = vmov 0   ;;  %vm38_vm0 = vcmask 1039360   ;;  %vm45_vm1 = vcmask 1042432   ;;  %s2063_s2 = inlined_call_operand.vmem [shape: f32[2,3,384], index: 2, kind: input, shape index: {}]   ;;  %s2064_s1 = inlined_call_operand.vmem [shape: f32[8,1], index: 1, kind: input, shape index: {}]   ;;  %s2065_s0 = inlined_call_operand.vmem [shape: f32[9,8,3], index: 0, kind: input, shape index: {}]   ;;  %s2066_s3 = inlined_call_operand.vmem [shape: f32[2,8,256], index: 3, kind: output, shape index: {}]  }
   0x1   :  { %v28_v0 = vld [vmem:[%s2063_s2 + $0x14] sm:$0x7]  ;;  %v26_v1 = vld [vmem:[%s2063_s2 + $0x8] sm:$0x7]  ;;  %v27_v2 = vld [vmem:[%s2063_s2 + $0xc] sm:$0x77]  ;;  %114 = vmatprep.mubr.f32.mxu0 %v1785_v3  ;;  %200 = vmatprep.mubr.f32.mxu1 %v1785_v3 }
   0x2   :  { %128 = vrot.lane.b32.xlu1 %v28_v0, %s1786_s18  ;;  %36 = vrot.lane.b32.xlu0 %v26_v1, %s1786_s18  ;;  %v123_v4 = vcombine.high %v27_v2, %v27_v2  ;;  %v25_v5 = vld [vmem:[%s2063_s2] sm:$0x77]  ;;  %v365_v9 = vld [vmem:[%s2063_s2 + $0x8] sm:$0x7]  ;;  %s1788_s9 = smov 112   ;;  %vm41_vm2 = vcmask 23552  }
   0x3   :  { %v31_v6 = vcombine.high %v25_v5, %v25_v5  ;;  %v364_v7 = vld [vmem:[%s2063_s2] sm:$0x77]  ;;  %v366_v10 = vld [vmem:[%s2063_s2 + $0xc] sm:$0x77]  ;;  %v367_v12 = vld [vmem:[%s2063_s2 + $0x14] sm:$0x7]  ;;  %1766 = vset.pattern.permute.xlu0 %v1793_v47 }
   0x4   :  { %v370_v8 = vcombine.high %v364_v7, %v364_v7  ;;  %v460_v11 = vcombine.high %v366_v10, %v366_v10  ;;  %v548_v13 = vld [vmem:[%s2063_s2] sm:$0x77]  ;;  %v549_v15 = vld [vmem:[%s2063_s2 + $0x8] sm:$0x7]  ;;  %v550_v16 = vld [vmem:[%s2063_s2 + $0xc] sm:$0x77] }
   0x5   :  { %v554_v14 = vcombine.high %v548_v13, %v548_v13  ;;  %v644_v17 = vcombine.high %v550_v16, %v550_v16  ;;  %v551_v18 = vld [vmem:[%s2063_s2 + $0x14] sm:$0x7]  ;;  %v732_v19 = vld [vmem:[%s2063_s2] sm:$0x77]  ;;  %v733_v21 = vld [vmem:[%s2063_s2 + $0x8] sm:$0x7] }
   0x6   :  { %126 = vrot.lane.b32.xlu1 %v123_v4, %s1786_s18  ;;  %34 = vrot.lane.b32.xlu0 %v31_v6, %s1786_s18  ;;  %v738_v20 = vcombine.high %v732_v19, %v732_v19  ;;  %v734_v22 = vld [vmem:[%s2063_s2 + $0xc] sm:$0x77]  ;;  %v735_v24 = vld [vmem:[%s2063_s2 + $0x14] sm:$0x7]  ;;  %vm377_vm3 = vcmask 1031168   ;;  %vm561_vm4 = vcmask 916480  }
   0x7   :  { %v828_v23 = vcombine.high %v734_v22, %v734_v22  ;;  %v916_v25 = vld [vmem:[%s2063_s2] sm:$0x77]  ;;  %v917_v27 = vld [vmem:[%s2063_s2 + $0x8] sm:$0x7]  ;;  %v918_v28 = vld [vmem:[%s2063_s2 + $0xc] sm:$0x77] }
   0x8   :  { %v922_v26 = vcombine.high %v916_v25, %v916_v25  ;;  %v1012_v29 = vcombine.high %v918_v28, %v918_v28  ;;  %v919_v30 = vld [vmem:[%s2063_s2 + $0x14] sm:$0x7]  ;;  %v1100_v31 = vld [vmem:[%s2063_s2] sm:$0x77]  ;;  %v1101_v33 = vld [vmem:[%s2063_s2 + $0x8] sm:$0x7] }
   0x9   :  { %v1106_v32 = vcombine.high %v1100_v31, %v1100_v31  ;;  %v1102_v34 = vld [vmem:[%s2063_s2 + $0xc] sm:$0x77]  ;;  %v1103_v36 = vld [vmem:[%s2063_s2 + $0x14] sm:$0x7]  ;;  %v1284_v37 = vld [vmem:[%s2063_s2] sm:$0x77] }
   0xa   :  { %124 = vrot.lane.b32.xlu1 %v27_v2, %s1786_s18  ;;  %32 = vrot.lane.b32.xlu0 %v25_v5, %s1786_s18  ;;  %s1789_s18 = smov 111   ;;  %v1196_v35 = vcombine.high %v1102_v34, %v1102_v34  ;;  %v1290_v38 = vcombine.high %v1284_v37, %v1284_v37  ;;  %v1285_v39 = vld [vmem:[%s2063_s2 + $0x8] sm:$0x7]  ;;  %v1286_v40 = vld [vmem:[%s2063_s2 + $0xc] sm:$0x77]  ;;  %vm745_vm5 = vcmask 908288  }
   0xb   :  { %v1380_v41 = vcombine.high %v1286_v40, %v1286_v40  ;;  %v1287_v42 = vld [vmem:[%s2063_s2 + $0x14] sm:$0x7]  ;;  %v1468_v43 = vld [vmem:[%s2063_s2] sm:$0x77]  ;;  %v1469_v45 = vld [vmem:[%s2063_s2 + $0x8] sm:$0x7] }
   0xc   :  { %v1474_v44 = vcombine.high %v1468_v43, %v1468_v43  ;;  %v1470_v46 = vld [vmem:[%s2063_s2 + $0xc] sm:$0x77]  ;;  %v1471_v49 = vld [vmem:[%s2063_s2 + $0x14] sm:$0x7]  ;;  %v1652_v50 = vld [vmem:[%s2064_s1] sm:$0xff]  ;;  %vm929_vm6 = vcmask 900096  }
   0xd   :  { %v1564_v48 = vcombine.high %v1470_v46, %v1470_v46  ;;  %v23_v55 = vld [vmem:[%s2063_s2] sm:$0x77]  ;;  %v24_v58 = vld [vmem:[%s2063_s2 + $0xc] sm:$0x77]  ;;  %vm1113_vm7 = vcmask 785408   ;;  %vm1297_vm8 = vcmask 777216  }
   0xe   :  { %375 = vrot.lane.b32.xlu1 %v365_v9, %s1787_s27  ;;  %373 = vrot.lane.b32.xlu0 %v370_v8, %s1787_s27  ;;  %v208_v59 = vcombine.high %v23_v55, %v23_v55  ;;  %v15_v62 = vld [vmem:[%s2065_s0 + $0x8] sm:$0xff]  ;;  %v288_v1 = vcombine.high %v24_v58, %v24_v58  ;;  %v14_v8 = vld [vmem:[%s2065_s0] sm:$0xff]  ;;  %vm1481_vm9 = vcmask 769024  }
  0x12   :  { %465 = vrot.lane.b32.xlu1 %v367_v12, %s1787_s27  ;;  %463 = vrot.lane.b32.xlu0 %v460_v11, %s1787_s27 }
  0x16   :  { %461 = vrot.lane.b32.xlu1 %v366_v10, %s1787_s27  ;;  %371 = vrot.lane.b32.xlu0 %v364_v7, %s1787_s27  ;;  %s1790_s27 = smov 110  }
  0x1a   :  { %559 = vrot.lane.b32.xlu1 %v549_v15, %s1788_s9  ;;  %557 = vrot.lane.b32.xlu0 %v554_v14, %s1788_s9 }
  0x1e   :  { %649 = vrot.lane.b32.xlu1 %v551_v18, %s1788_s9  ;;  %647 = vrot.lane.b32.xlu0 %v644_v17, %s1788_s9 }
  0x22   :  { %645 = vrot.lane.b32.xlu1 %v550_v16, %s1788_s9  ;;  %555 = vrot.lane.b32.xlu0 %v548_v13, %s1788_s9  ;;  %s1791_s9 = smov 96   ;;  %v16_v16 = vld [vmem:[%s2065_s0 + $0x10] sm:$0xff] }
  0x26   :  { %743 = vrot.lane.b32.xlu1 %v733_v21, %s1789_s18  ;;  %741 = vrot.lane.b32.xlu0 %v738_v20, %s1789_s18 }
  0x2a   :  { %833 = vrot.lane.b32.xlu1 %v735_v24, %s1789_s18  ;;  %831 = vrot.lane.b32.xlu0 %v828_v23, %s1789_s18  ;;  %v17_v23 = vld [vmem:[%s2065_s0 + $0x18] sm:$0xff] }
  0x2e   :  { %829 = vrot.lane.b32.xlu1 %v734_v22, %s1789_s18  ;;  %739 = vrot.lane.b32.xlu0 %v732_v19, %s1789_s18  ;;  %s1792_s18 = smov 95  }
  0x32   :  { %927 = vrot.lane.b32.xlu1 %v917_v27, %s1790_s27  ;;  %925 = vrot.lane.b32.xlu0 %v922_v26, %s1790_s27 }
  0x36   :  { %1017 = vrot.lane.b32.xlu1 %v919_v30, %s1790_s27  ;;  %1015 = vrot.lane.b32.xlu0 %v1012_v29, %s1790_s27 }
  0x3a   :  { %1013 = vrot.lane.b32.xlu1 %v918_v28, %s1790_s27  ;;  %923 = vrot.lane.b32.xlu0 %v916_v25, %s1790_s27  ;;  %s1794_s27 = smov 94  }
  0x3e   :  { %1111 = vrot.lane.b32.xlu1 %v1101_v33, %s1791_s9  ;;  %1109 = vrot.lane.b32.xlu0 %v1106_v32, %s1791_s9 }
  0x42   :  { %1201 = vrot.lane.b32.xlu1 %v1103_v36, %s1791_s9  ;;  %1199 = vrot.lane.b32.xlu0 %v1196_v35, %s1791_s9 }
  0x46   :  { %1197 = vrot.lane.b32.xlu1 %v1102_v34, %s1791_s9  ;;  %1107 = vrot.lane.b32.xlu0 %v1100_v31, %s1791_s9  ;;  %v18_v34 = vld [vmem:[%s2065_s0 + $0x20] sm:$0xff] }
  0x4a   :  { %1295 = vrot.lane.b32.xlu1 %v1285_v39, %s1792_s18  ;;  %1293 = vrot.lane.b32.xlu0 %v1290_v38, %s1792_s18 }
  0x4e   :  { %1385 = vrot.lane.b32.xlu1 %v1287_v42, %s1792_s18  ;;  %1383 = vrot.lane.b32.xlu0 %v1380_v41, %s1792_s18 }
  0x52   :  { %1381 = vrot.lane.b32.xlu1 %v1286_v40, %s1792_s18  ;;  %1291 = vrot.lane.b32.xlu0 %v1284_v37, %s1792_s18 }
  0x56   :  { %1479 = vrot.lane.b32.xlu1 %v1469_v45, %s1794_s27  ;;  %1477 = vrot.lane.b32.xlu0 %v1474_v44, %s1794_s27  ;;  %v19_v45 = vld [vmem:[%s2065_s0 + $0x28] sm:$0xff] }
  0x5a   :  { %1569 = vrot.lane.b32.xlu1 %v1471_v49, %s1794_s27  ;;  %1567 = vrot.lane.b32.xlu0 %v1564_v48, %s1794_s27 }
  0x5e   :  { %1565 = vrot.lane.b32.xlu1 %v1470_v46, %s1794_s27  ;;  %1475 = vrot.lane.b32.xlu0 %v1468_v43, %s1794_s27 }
  0x62   :  { %1655 = vperm.xlu0 %1766, %v1652_v50  }
  0x74   :  { %v129_v51 = vpop.permute.xlu1 %128  ;;  %v37_v52 = vpop.permute.xlu0 %36 }
  0x78   :  { %v127_v53 = vpop.permute.xlu1 %126  ;;  %v35_v54 = vpop.permute.xlu0 %34 }
  0x79   :  { %v40_v56 = vsel %vm38_vm0, %v35_v54, %v37_v52  ;;  %v131_v57 = vsel %vm38_vm0, %v127_v53, %v129_v51 }
  0x7a   :  { %1670 = vmatprep.subr.msk.mxu0 %vm45_vm1, %v40_v56  ;;  %1673 = vmatprep.subr.msk.mxu1 %vm45_vm1, %v131_v57  ;;  %v20_v56 = vld [vmem:[%s2065_s0 + $0x30] sm:$0xff] }
  0x7c   :  { %v125_v60 = vpop.permute.xlu1 %124  ;;  %v33_v61 = vpop.permute.xlu0 %32 }
  0x7d   :  { %v39_v63 = vsel %vm38_vm0, %v33_v61, %v35_v54  ;;  %v130_v0 = vsel %vm38_vm0, %v125_v60, %v127_v53 }
  0x7e   :  { %1671 = vmatpush1.msk.msra.mxu0 %vm45_vm1, %v39_v63  ;;  %1674 = vmatpush1.msk.msra.mxu1 %vm45_vm1, %v130_v0 }
  0x7f   :  { %1676 = vmatprep.subr.msk.mxu0 %vm45_vm1, %v208_v59  ;;  %1672 = vmatmul.mubr.msk.f32.vlgmr.msra.gmra.mrb[0].mxu0 %vm41_vm2, %v15_v62 }
  0x80   :  { %v376_v2 = vpop.permute.xlu1 %375  ;;  %v374_v4 = vpop.permute.xlu0 %373  ;;  %1677 = vmatpush1.msk.msra.mxu0 %vm45_vm1, %v23_v55  ;;  %1675 = vmatmul.mubr.msk.f32.vlgmr.msra.gmra.mrb[0].mxu1 %vm41_vm2, %v15_v62 }
  0x81   :  { %v379_v5 = vsel %vm377_vm3, %v374_v4, %v376_v2  ;;  %1679 = vmatprep.subr.msk.mxu1 %vm45_vm1, %v288_v1  ;;  %280 = vmatprep.mubr.f32.mxu0 %v1785_v3 }
  0x82   :  { %1682 = vmatprep.subr.msk.mxu0 %vm45_vm1, %v379_v5  ;;  %1680 = vmatpush1.msk.msra.mxu1 %vm45_vm1, %v24_v58 }
  0x83   :  { %357 = vmatprep.mubr.f32.mxu1 %v1785_v3 }
  0x84   :  { %v466_v6 = vpop.permute.xlu1 %465  ;;  %v464_v7 = vpop.permute.xlu0 %463 }
  0x85   :  { %v468_v9 = vsel %vm377_vm3, %v464_v7, %v466_v6 }
  0x86   :  { %1685 = vmatprep.subr.msk.mxu1 %vm45_vm1, %v468_v9 }
  0x87   :  { %1678 = vmatmul.mubr.msk.f32.vlgmr.msra.gmra.mrb[0].mxu0 %vm41_vm2, %v14_v8 }
  0x88   :  { %v462_v10 = vpop.permute.xlu1 %461  ;;  %v372_v11 = vpop.permute.xlu0 %371  ;;  %1681 = vmatmul.mubr.msk.f32.vlgmr.msra.gmra.mrb[0].mxu1 %vm41_vm2, %v14_v8  ;;  %451 = vmatprep.mubr.f32.mxu0 %v1785_v3 }
  0x89   :  { %v467_v12 = vsel %vm377_vm3, %v462_v10, %v464_v7  ;;  %v378_v13 = vsel %vm377_vm3, %v372_v11, %v374_v4  ;;  %537 = vmatprep.mubr.f32.mxu1 %v1785_v3  ;;  %v21_v4 = vld [vmem:[%s2065_s0 + $0x38] sm:$0xff] }
  0x8a   :  { %1683 = vmatpush1.msk.msra.mxu0 %vm45_vm1, %v378_v13  ;;  %1686 = vmatpush1.msk.msra.mxu1 %vm45_vm1, %v467_v12 }
  0x8c   :  { %v560_v14 = vpop.permute.xlu1 %559  ;;  %v558_v15 = vpop.permute.xlu0 %557 }
  0x8d   :  { %v563_v17 = vsel %vm561_vm4, %v558_v15, %v560_v14 }
  0x8e   :  { %1688 = vmatprep.subr.msk.mxu0 %vm45_vm1, %v563_v17 }
  0x8f   :  { %1684 = vmatmul.mubr.msk.f32.vlgmr.msra.gmra.mrb[0].mxu0 %vm41_vm2, %v16_v16 }
  0x90   :  { %v650_v18 = vpop.permute.xlu1 %649  ;;  %v648_v19 = vpop.permute.xlu0 %647  ;;  %1687 = vmatmul.mubr.msk.f32.vlgmr.msra.gmra.mrb[0].mxu1 %vm41_vm2, %v16_v16  ;;  %635 = vmatprep.mubr.f32.mxu0 %v1785_v3 }
  0x91   :  { %v652_v20 = vsel %vm561_vm4, %v648_v19, %v650_v18  ;;  %721 = vmatprep.mubr.f32.mxu1 %v1785_v3 }
  0x92   :  { %1691 = vmatprep.subr.msk.mxu1 %vm45_vm1, %v652_v20 }
  0x94   :  { %v646_v21 = vpop.permute.xlu1 %645  ;;  %v556_v22 = vpop.permute.xlu0 %555 }
  0x95   :  { %v651_v24 = vsel %vm561_vm4, %v646_v21, %v648_v19  ;;  %v562_v25 = vsel %vm561_vm4, %v556_v22, %v558_v15  ;;  %v22_v15 = vld [vmem:[%s2065_s0 + $0x40] sm:$0xff] }
  0x96   :  { %1689 = vmatpush1.msk.msra.mxu0 %vm45_vm1, %v562_v25  ;;  %1692 = vmatpush1.msk.msra.mxu1 %vm45_vm1, %v651_v24 }
  0x97   :  { %1690 = vmatmul.mubr.msk.f32.vlgmr.msra.gmra.mrb[0].mxu0 %vm41_vm2, %v17_v23 }
  0x98   :  { %v744_v26 = vpop.permute.xlu1 %743  ;;  %v742_v27 = vpop.permute.xlu0 %741  ;;  %1693 = vmatmul.mubr.msk.f32.vlgmr.msra.gmra.mrb[0].mxu1 %vm41_vm2, %v17_v23  ;;  %819 = vmatprep.mubr.f32.mxu0 %v1785_v3 }
  0x99   :  { %v747_v28 = vsel %vm745_vm5, %v742_v27, %v744_v26  ;;  %905 = vmatprep.mubr.f32.mxu1 %v1785_v3 }
  0x9a   :  { %1694 = vmatprep.subr.msk.mxu0 %vm45_vm1, %v747_v28 }
  0x9c   :  { %v834_v29 = vpop.permute.xlu1 %833  ;;  %v832_v30 = vpop.permute.xlu0 %831 }
  0x9d   :  { %v836_v31 = vsel %vm745_vm5, %v832_v30, %v834_v29 }
  0x9e   :  { %1697 = vmatprep.subr.msk.mxu1 %vm45_vm1, %v836_v31 }
  0xa0   :  { %v830_v32 = vpop.permute.xlu1 %829  ;;  %v740_v33 = vpop.permute.xlu0 %739 }
  0xa1   :  { %v835_v35 = vsel %vm745_vm5, %v830_v32, %v832_v30  ;;  %v746_v36 = vsel %vm745_vm5, %v740_v33, %v742_v27 }
  0xa2   :  { %1695 = vmatpush1.msk.msra.mxu0 %vm45_vm1, %v746_v36  ;;  %1698 = vmatpush1.msk.msra.mxu1 %vm45_vm1, %v835_v35 }
  0xa3   :  { %1696 = vmatmul.mubr.msk.f32.vlgmr.msra.gmra.mrb[0].mxu0 %vm41_vm2, %v18_v34  ;;  %1699 = vmatmul.mubr.msk.f32.vlgmr.msra.gmra.mrb[0].mxu1 %vm41_vm2, %v18_v34 }
  0xa4   :  { %v928_v37 = vpop.permute.xlu1 %927  ;;  %v926_v38 = vpop.permute.xlu0 %925  ;;  %1003 = vmatprep.mubr.f32.mxu0 %v1785_v3  ;;  %1089 = vmatprep.mubr.f32.mxu1 %v1785_v3 }
  0xa5   :  { %v931_v39 = vsel %vm929_vm6, %v926_v38, %v928_v37 }
  0xa6   :  { %1700 = vmatprep.subr.msk.mxu0 %vm45_vm1, %v931_v39 }
  0xa8   :  { %v1018_v40 = vpop.permute.xlu1 %1017  ;;  %v1016_v41 = vpop.permute.xlu0 %1015 }
  0xa9   :  { %v1020_v42 = vsel %vm929_vm6, %v1016_v41, %v1018_v40 }
  0xaa   :  { %1703 = vmatprep.subr.msk.mxu1 %vm45_vm1, %v1020_v42 }
  0xac   :  { %v1014_v43 = vpop.permute.xlu1 %1013  ;;  %v924_v44 = vpop.permute.xlu0 %923 }
  0xad   :  { %v1019_v46 = vsel %vm929_vm6, %v1014_v43, %v1016_v41  ;;  %v930_v47 = vsel %vm929_vm6, %v924_v44, %v926_v38 }
  0xae   :  { %1701 = vmatpush1.msk.msra.mxu0 %vm45_vm1, %v930_v47  ;;  %1704 = vmatpush1.msk.msra.mxu1 %vm45_vm1, %v1019_v46 }
  0xaf   :  { %1702 = vmatmul.mubr.msk.f32.vlgmr.msra.gmra.mrb[0].mxu0 %vm41_vm2, %v19_v45  ;;  %1705 = vmatmul.mubr.msk.f32.vlgmr.msra.gmra.mrb[0].mxu1 %vm41_vm2, %v19_v45 }
  0xb0   :  { %v1112_v48 = vpop.permute.xlu1 %1111  ;;  %v1110_v49 = vpop.permute.xlu0 %1109  ;;  %1187 = vmatprep.mubr.f32.mxu0 %v1785_v3  ;;  %1273 = vmatprep.mubr.f32.mxu1 %v1785_v3 }
  0xb1   :  { %v1115_v50 = vsel %vm1113_vm7, %v1110_v49, %v1112_v48 }
  0xb2   :  { %1706 = vmatprep.subr.msk.mxu0 %vm45_vm1, %v1115_v50 }
  0xb4   :  { %v1202_v51 = vpop.permute.xlu1 %1201  ;;  %v1200_v52 = vpop.permute.xlu0 %1199 }
  0xb5   :  { %v1204_v53 = vsel %vm1113_vm7, %v1200_v52, %v1202_v51 }
  0xb6   :  { %1709 = vmatprep.subr.msk.mxu1 %vm45_vm1, %v1204_v53 }
  0xb8   :  { %v1198_v54 = vpop.permute.xlu1 %1197  ;;  %v1108_v55 = vpop.permute.xlu0 %1107 }
  0xb9   :  { %v1203_v57 = vsel %vm1113_vm7, %v1198_v54, %v1200_v52  ;;  %v1114_v58 = vsel %vm1113_vm7, %v1108_v55, %v1110_v49 }
  0xba   :  { %1707 = vmatpush1.msk.msra.mxu0 %vm45_vm1, %v1114_v58  ;;  %1710 = vmatpush1.msk.msra.mxu1 %vm45_vm1, %v1203_v57 }
  0xbb   :  { %1708 = vmatmul.mubr.msk.f32.vlgmr.msra.gmra.mrb[0].mxu0 %vm41_vm2, %v20_v56  ;;  %1711 = vmatmul.mubr.msk.f32.vlgmr.msra.gmra.mrb[0].mxu1 %vm41_vm2, %v20_v56 }
  0xbc   :  { %v1296_v59 = vpop.permute.xlu1 %1295  ;;  %v1294_v60 = vpop.permute.xlu0 %1293  ;;  %1371 = vmatprep.mubr.f32.mxu0 %v1785_v3  ;;  %1457 = vmatprep.mubr.f32.mxu1 %v1785_v3 }
  0xbd   :  { %v1299_v61 = vsel %vm1297_vm8, %v1294_v60, %v1296_v59 }
  0xbe   :  { %1712 = vmatprep.subr.msk.mxu0 %vm45_vm1, %v1299_v61 }
  0xc0   :  { %v1386_v62 = vpop.permute.xlu1 %1385  ;;  %v1384_v63 = vpop.permute.xlu0 %1383 }
  0xc1   :  { %v1388_v0 = vsel %vm1297_vm8, %v1384_v63, %v1386_v62 }
  0xc2   :  { %1715 = vmatprep.subr.msk.mxu1 %vm45_vm1, %v1388_v0 }
  0xc4   :  { %v1382_v1 = vpop.permute.xlu1 %1381  ;;  %v1292_v2 = vpop.permute.xlu0 %1291 }
  0xc5   :  { %v1387_v5 = vsel %vm1297_vm8, %v1382_v1, %v1384_v63  ;;  %v1298_v6 = vsel %vm1297_vm8, %v1292_v2, %v1294_v60 }
  0xc6   :  { %1713 = vmatpush1.msk.msra.mxu0 %vm45_vm1, %v1298_v6  ;;  %1716 = vmatpush1.msk.msra.mxu1 %vm45_vm1, %v1387_v5 }
  0xc7   :  { %1714 = vmatmul.mubr.msk.f32.vlgmr.msra.gmra.mrb[0].mxu0 %vm41_vm2, %v21_v4  ;;  %1717 = vmatmul.mubr.msk.f32.vlgmr.msra.gmra.mrb[0].mxu1 %vm41_vm2, %v21_v4 }
  0xc8   :  { %v1480_v7 = vpop.permute.xlu1 %1479  ;;  %v1478_v8 = vpop.permute.xlu0 %1477  ;;  %1555 = vmatprep.mubr.f32.mxu0 %v1785_v3  ;;  %1641 = vmatprep.mubr.f32.mxu1 %v1785_v3 }
  0xc9   :  { %v1483_v9 = vsel %vm1481_vm9, %v1478_v8, %v1480_v7 }
  0xca   :  { %1718 = vmatprep.subr.msk.mxu0 %vm45_vm1, %v1483_v9 }
  0xcc   :  { %v1570_v10 = vpop.permute.xlu1 %1569  ;;  %v1568_v11 = vpop.permute.xlu0 %1567 }
  0xcd   :  { %v1572_v12 = vsel %vm1481_vm9, %v1568_v11, %v1570_v10 }
  0xce   :  { %1721 = vmatprep.subr.msk.mxu1 %vm45_vm1, %v1572_v12 }
  0xd0   :  { %v1566_v13 = vpop.permute.xlu1 %1565  ;;  %v1476_v14 = vpop.permute.xlu0 %1475 }
  0xd1   :  { %v1571_v16 = vsel %vm1481_vm9, %v1566_v13, %v1568_v11  ;;  %v1482_v3 = vsel %vm1481_vm9, %v1476_v14, %v1478_v8 }
  0xd2   :  { %1719 = vmatpush1.msk.msra.mxu0 %vm45_vm1, %v1482_v3  ;;  %1722 = vmatpush1.msk.msra.mxu1 %vm45_vm1, %v1571_v16 }
  0xd3   :  { %1720 = vmatmul.mubr.msk.f32.vlgmr.msra.gmra.mrb[0].mxu0 %vm41_vm2, %v22_v15  ;;  %1723 = vmatmul.mubr.msk.f32.vlgmr.msra.gmra.mrb[0].mxu1 %vm41_vm2, %v22_v15 }
  0xe1   :  { %v1656_v17 = vpop.permute.xlu0 %1655 }
 0x1a6   :  { %v1557_v18 = vpop.f32.mrb[0].mxu0  ;;  %v1643_v19 = vpop.f32.mrb[0].mxu1 }
 0x1a7   :  { %v1658_v20 = vadd.f32 %v1656_v17, %v1557_v18  ;;  %v1660_v21 = vadd.f32 %v1656_v17, %v1643_v19  ;;  %v1559_v22 = vpop.f32.mrb[1].mxu0  ;;  %v1645_v23 = vpop.f32.mrb[1].mxu1 }
 0x1a8   :  { %v1659_v24 = vadd.f32 %v1656_v17, %v1559_v22  ;;  %v1661_v25 = vadd.f32 %v1656_v17, %v1645_v23 }
 0x1a9   :  { %1662 = vst [vmem:[%s2066_s3] sm:$0xff] %v1658_v20  ;;  %1664 = vst [vmem:[%s2066_s3 + $0x10] sm:$0xff] %v1660_v21 }
 0x1aa   :  { %1663 = vst [vmem:[%s2066_s3 + $0x8] sm:$0xff] %v1659_v24  ;;  %1665 = vst [vmem:[%s2066_s3 + $0x18] sm:$0xff] %v1661_v25 }

</bundles_post_ra>
